<compile_context>
chip_gen: v5e
topology: v5e:2x2
jax: 0.10.0
libtpu: 0.0.40
codegen_flags: <defaults>
</compile_context>

<pallas_src>
import functools

import jax
import jax.numpy as jnp
from jax.experimental import pallas as pl
from jax.experimental.pallas import tpu as pltpu


def _round_up(n, m):
    return ((n + m - 1) // m) * m


def _clamped_softmax_kernel(x_ref, o_ref, *, min_prob):
    # Full (tile_b, H) tile; compute in f32 for stability.
    x = x_ref[...].astype(jnp.float32)
    m = jnp.max(x, axis=-1, keepdims=True)
    e = jnp.exp(x - m)
    s = jnp.sum(e, axis=-1, keepdims=True)
    # Fused clamp + renormalize (mathematically identical to
    # clamp(e/s, min_prob) / sum(clamp(e/s, min_prob))).
    q = jnp.maximum(e, jnp.float32(min_prob) * s)
    z = jnp.sum(q, axis=-1, keepdims=True)
    # Exact reciprocal keeps the result within ~1 ulp of the reference; the
    # kernel is HBM-bound at these tile sizes so the VPU work is hidden by DMA.
    o_ref[...] = (q * pl.reciprocal(z, approx=False)).astype(o_ref.dtype)


def _largest_mult8_divisor(b, target):
    """Largest multiple-of-8 divisor of `b` that is <= target (or None)."""
    t = min(target, b)
    t = (t // 8) * 8
    while t >= 8:
        if b % t == 0:
            return t
        t -= 8
    return None


_SINGLE_BLOCK_BYTES = 4 << 20      # whole-array-in-one-block cutoff
_TARGET_TILE_BYTES = 2 << 20       # per-step input bytes target
_MIN_DIVISOR_TILE_BYTES = 128 << 10  # below this, padding to a bigger tile wins
_MAX_TILE_ROWS = 4096


def _choose_tiling(B, H, itemsize):
    """Returns (tile_b, b_pad, grid)."""
    row_bytes = H * itemsize

    # Path 1: single full-array block -> no (8,128) constraint, no padding.
    if B * row_bytes <= _SINGLE_BLOCK_BYTES:
        return B, B, 1

    # Target rows per step: amortize the ~0.35us/step overhead, stay VMEM-safe,
    # and keep >= 2 grid steps so v7x can shard across its two TensorCores.
    target = max(8, _TARGET_TILE_BYTES // max(1, row_bytes))
    target = min(int(target), _MAX_TILE_ROWS)
    b8 = _round_up(B, 8)
    if b8 > 8:
        target = min(target, _round_up((b8 + 1) // 2, 8))
    target = max(8, (target // 8) * 8)

    # Path 2: a divisor of B avoids the jnp.pad copy (a full extra HBM pass).
    if B % 8 == 0:
        d = _largest_mult8_divisor(B, target)
        if d is not None and (d >= target or d * row_bytes >= _MIN_DIVISOR_TILE_BYTES):
            return d, B, B // d

    # Path 3: pad rows up to a multiple of the target tile.
    tile_b = target
    b_pad = _round_up(B, tile_b)
    return tile_b, b_pad, b_pad // tile_b


def _clamped_softmax_2d(x, min_prob):
    B, H = x.shape
    itemsize = jnp.dtype(x.dtype).itemsize
    tile_b, b_pad, grid = _choose_tiling(B, H, itemsize)
    if b_pad != B:
        x = jnp.pad(x, ((0, b_pad - B), (0, 0)))

    # Conservative scoped-VMEM request: double-buffered in+out tiles plus f32
    # intermediates, clamped to a range safe on all generations (v7x: 64 MiB
    # physical per TensorCore; v5e default scoped limit is only 16 MiB).
    tile_bytes = tile_b * H * itemsize
    vmem_needed = 4 * tile_bytes + 4 * tile_b * H * 4 + (1 << 20)
    vmem_limit = int(min(max(vmem_needed, 32 << 20), 56 << 20))

    kernel = functools.partial(_clamped_softmax_kernel, min_prob=float(min_prob))
    out = pl.pallas_call(
        kernel,
        out_shape=jax.ShapeDtypeStruct((b_pad, H), x.dtype),
        grid_spec=pltpu.PrefetchScalarGridSpec(
            num_scalar_prefetch=0,
            grid=(grid,),
            in_specs=[pl.BlockSpec((tile_b, H), lambda i: (i, 0))],
            out_specs=pl.BlockSpec((tile_b, H), lambda i: (i, 0)),
        ),
        compiler_params=pltpu.CompilerParams(
            dimension_semantics=("parallel",),
            vmem_limit_bytes=vmem_limit,
        ),
        cost_estimate=pl.CostEstimate(
            flops=6 * b_pad * H,
            transcendentals=b_pad * H,
            bytes_accessed=2 * b_pad * H * itemsize,
        ),
    )(x)
    return out[:B] if b_pad != B else out


def clamped_softmax(x, dim=-1, min_prob=1e-8):
    """softmax(x, dim) -> clamp(min=min_prob) -> renormalize (Pallas TPU)."""
    nd = x.ndim
    dim = dim % nd
    if dim != nd - 1:
        # Layout plumbing only: present a lane-dense (softmax-axis-last) slab.
        x = jnp.moveaxis(x, dim, -1)
    lead = x.shape[:-1]
    H = x.shape[-1]
    B = 1
    for d in lead:
        B *= int(d)
    out2d = _clamped_softmax_2d(x.reshape(B, H), min_prob)
    out = out2d.reshape(*lead, H) if lead else out2d.reshape(H)
    if dim != nd - 1:
        out = jnp.moveaxis(out, -1, dim)
    return out


def _reference(x, dim=-1, min_prob=1e-8):
    p = jax.nn.softmax(x.astype(jnp.float32), axis=dim)
    p = jnp.maximum(p, jnp.float32(min_prob))
    return (p / jnp.sum(p, axis=dim, keepdims=True)).astype(x.dtype)


if __name__ == "__main__":
    key = jax.random.PRNGKey(0)
    k1, k2, k3, k4 = jax.random.split(key, 4)

    # Case 1: small PPO-like logits, softmax over the last (hidden) axis.
    x1 = jax.random.normal(k1, (2, 4, 32), dtype=jnp.float32) * 5.0
    out1 = jax.block_until_ready(clamped_softmax(x1, dim=-1, min_prob=1e-8))
    ref1 = _reference(x1, dim=-1, min_prob=1e-8)
    assert out1.shape == x1.shape and out1.dtype == x1.dtype
    assert jnp.allclose(out1, ref1, atol=1e-6, rtol=1e-5)
    assert jnp.allclose(jnp.sum(out1, axis=-1), 1.0, atol=1e-5)

    # Case 2: ragged batch (not a multiple of 8) -> single-block path, no pad.
    x2 = jax.random.normal(k2, (5, 32), dtype=jnp.float32) * 5.0
    out2 = jax.block_until_ready(clamped_softmax(x2, dim=-1, min_prob=1e-8))
    ref2 = _reference(x2, dim=-1, min_prob=1e-8)
    assert out2.shape == x2.shape
    assert jnp.allclose(out2, ref2, atol=1e-6, rtol=1e-5)
    assert jnp.allclose(jnp.sum(out2, axis=-1), 1.0, atol=1e-5)

    # Case 3: softmax over a non-last axis (channel dim of a 4-D tensor).
    x3 = jax.random.normal(k3, (2, 4, 16, 16), dtype=jnp.float32) * 3.0
    out3 = jax.block_until_ready(clamped_softmax(x3, dim=1, min_prob=1e-8))
    ref3 = _reference(x3, dim=1, min_prob=1e-8)
    assert out3.shape == x3.shape
    assert jnp.allclose(out3, ref3, atol=1e-6, rtol=1e-5)
    assert jnp.allclose(jnp.sum(out3, axis=1), 1.0, atol=1e-5)

    # Case 4: larger ragged batch -> tiled (multi-step grid) + padding path.
    x4 = jax.random.normal(k4, (4099, 512), dtype=jnp.float32) * 5.0
    out4 = jax.block_until_ready(clamped_softmax(x4, dim=-1, min_prob=1e-8))
    ref4 = _reference(x4, dim=-1, min_prob=1e-8)
    assert out4.shape == x4.shape
    assert jnp.allclose(out4, ref4, atol=1e-6, rtol=1e-5)
    assert jnp.allclose(jnp.sum(out4, axis=-1), 1.0, atol=1e-5)

    print("KERNEL_OK")
</pallas_src>

<mosaic_0001>
module attributes {stable_mosaic.version = 11 : i64} {
  func.func @_clamped_softmax_kernel(%arg0: i32, %arg1: memref<8x32xf32, #tpu.memory_space<vmem>>, %arg2: memref<8x32xf32, #tpu.memory_space<vmem>>) attributes {dimension_semantics = [#tpu.dimension_semantics<parallel>], iteration_bounds = array<i64: 1>, scalar_prefetch = 0 : i64, scratch_operands = 0 : i64, tpu.core_type = #tpu.core_type<tc>, window_params = [{transform_indices = @transform_0, window_bounds = array<i64: 8, 32>}, {transform_indices = @transform_1, window_bounds = array<i64: 8, 32>}]} {
    %c0 = arith.constant 0 : index
    %c0_0 = arith.constant 0 : index
    %0 = vector.load %arg1[%c0, %c0_0] : memref<8x32xf32, #tpu.memory_space<vmem>>, vector<8x32xf32>
    %cst = arith.constant dense<0xFF800000> : vector<8xf32>
    %1 = vector.multi_reduction <maximumf>, %0, %cst [1] : vector<8x32xf32> to vector<8xf32>
    %2 = vector.shape_cast %1 : vector<8xf32> to vector<8x1xf32>
    %3 = vector.broadcast %2 : vector<8x1xf32> to vector<8x32xf32>
    %4 = arith.subf %0, %3 : vector<8x32xf32>
    %5 = math.exp %4 : vector<8x32xf32>
    %cst_1 = arith.constant dense<0.000000e+00> : vector<8xf32>
    %6 = vector.multi_reduction <add>, %5, %cst_1 [1] : vector<8x32xf32> to vector<8xf32>
    %7 = vector.shape_cast %6 : vector<8xf32> to vector<8x1xf32>
    %cst_2 = arith.constant 9.99999993E-9 : f32
    %8 = vector.broadcast %cst_2 : f32 to vector<8x1xf32>
    %9 = arith.mulf %8, %7 : vector<8x1xf32>
    %10 = vector.broadcast %9 : vector<8x1xf32> to vector<8x32xf32>
    %11 = arith.maximumf %5, %10 : vector<8x32xf32>
    %cst_3 = arith.constant dense<0.000000e+00> : vector<8xf32>
    %12 = vector.multi_reduction <add>, %11, %cst_3 [1] : vector<8x32xf32> to vector<8xf32>
    %13 = vector.shape_cast %12 : vector<8xf32> to vector<8x1xf32>
    %14 = tpu.reciprocal %13 : vector<8x1xf32> -> vector<8x1xf32>
    %15 = vector.broadcast %14 : vector<8x1xf32> to vector<8x32xf32>
    %16 = arith.mulf %11, %15 : vector<8x32xf32>
    %c0_4 = arith.constant 0 : index
    %c0_5 = arith.constant 0 : index
    %17 = vector.load %arg2[%c0_4, %c0_5] : memref<8x32xf32, #tpu.memory_space<vmem>>, vector<8x32xf32>
    tpu.vector_store %arg2[%c0_4, %c0_5], %16 {strides = array<i32>} : memref<8x32xf32, #tpu.memory_space<vmem>>, vector<8x32xf32>,
    return
  }
  func.func @transform_0(%arg0: i32) -> (i32, i32) {
    %c0_i32 = arith.constant 0 : i32
    %c0_i32_0 = arith.constant 0 : i32
    return %arg0, %c0_i32 : i32, i32
  }
  func.func @transform_1(%arg0: i32) -> (i32, i32) {
    %c0_i32 = arith.constant 0 : i32
    %c0_i32_0 = arith.constant 0 : i32
    return %arg0, %c0_i32 : i32, i32
  }
}

</mosaic_0001>

<bundles_post_ra>
// kernel: tpu_custom_call.1
= control target key start
LH: loop header
LB: loop body
LE: loop exit
PB: predicated region body
PF: predicated region fallthrough
CT: control target
= control target key end

     0   :  { %6 = vsyncpa [#allocation3], 0  ;;  %s152_s0 = inlined_call_operand.hbm [shape: f32[8,32], index: 0, kind: input, shape index: {}]   ;;  %s153_s1 = inlined_call_operand.hbm [shape: f32[8,32], index: 1, kind: output, shape index: {}]  }
   0x1   :  { %7 = vsyncpa [#allocation4], 0  ;;  %s13_s8 = sshll.u32 %s152_s0, 4  ;;  %s130_s9 = smov [#allocation2]   ;;  %s14_s8 = int_to_ptr.hbm [resolvable:$true] %s13_s8 }
   0x2   :  { %s15_s10 = sshll.u32 %s130_s9, 4  ;;  %s16_s10 = int_to_ptr.vmem [resolvable:$true] %s15_s10 }
   0x3   :  { %18 = dma.hbm_to_vmem [thread:$0]  %s14_s8, 128, %s16_s10, [#allocation3]  }
   0x4   :  { %126 = dma.done.wait [#allocation3], 128  }
   0x5   :  { %127 = vsyncadd [#allocation3], 4294967168  ;;  %vm24_vm0 = vcmask 261120   ;;  %v23_v0 = vld [vmem:[#allocation2] sm:$0xff]  ;;  %s131_s0 = smov [#allocation5]   ;;  %s62_s14 = sshll.u32 %s153_s1, 4  ;;  %s63_s14 = int_to_ptr.hbm [resolvable:$true] %s62_s14 }
   0x6   :  { %v25_v1 = vsel %vm24_vm0, %v23_v0, -inf  ;;  %s60_s11 = sshll.u32 %s131_s0, 4  ;;  %s61_s11 = int_to_ptr.vmem [resolvable:$true] %s60_s11 }
   0x7   :  { %26 = vmax.xlane.f32.xlu0 %v25_v1 }
  0x7a   :  { %v27_v2 = vpop.xlane.xlu0 %26 }
  0x7b   :  { %v28_v3 = vsub.f32 %v23_v0, %v27_v2 }
  0x7d   :  { %v29_v4 = vmul.f32 1.442695, %v28_v3 }
  0x7f   :  { %74 = vpow2.f32 %v29_v4 }
  0x85   :  { %v75_v5 = vpop.eup %74 }
  0x86   :  { %v31_v6 = vsel %vm24_vm0, %v75_v5, 0.0 }
  0x87   :  { %32 = vadd.xlane.f32.xlu0 %v31_v6 }
  0xfa   :  { %v33_v7 = vpop.xlane.xlu0 %32 }
  0xfb   :  { %v34_v8 = vmul.f32 1e-08, %v33_v7 }
  0xfd   :  { %v35_v9 = vmax.f32 %v75_v5, %v34_v8 }
  0xff   :  { %v36_v10 = vsel %vm24_vm0, %v35_v9, 0.0 }
 0x100   :  { %37 = vadd.xlane.f32.xlu1 %v36_v10 }
 0x173   :  { %v38_v11 = vpop.xlane.xlu1 %37 }
 0x174   :  { %76 = vrcp.f32 %v38_v11  ;;  %v50_v15 = vand.u32 2147483648, %v38_v11  ;;  %v48_v17 = vand.u32 2147483647, %v38_v11  ;;  %vm44_vm2 = vweird.f32 %v38_v11 }
 0x176   :  { %v51_v19 = vor.u32 1.1754944e-38, %v50_v15  ;;  %vm49_vm4 = vcmp.eq.f32.partialorder %v48_v17, 8.507059e+37 }
 0x17a   :  { %v77_v12 = vpop.eup %76 }
 0x17b   :  { %v40_v13 = vmul.f32 %v77_v12, %v38_v11  ;;  %vm45_vm1 = vweird.f32 %v77_v12 }
 0x17c   :  { %vm46_vm3 = vmor %vm44_vm2, %vm45_vm1 }
 0x17d   :  { %v41_v14 = vsub.f32 1.0, %v40_v13 }
 0x17f   :  { %v42_v16 = vmul.f32 %v77_v12, %v41_v14 }
 0x181   :  { %v43_v18 = vadd.f32 %v77_v12, %v42_v16 }
 0x183   :  { %v47_v20 = vsel %vm46_vm3, %v77_v12, %v43_v18 }
 0x184   :  { %v52_v21 = vsel %vm49_vm4, %v51_v19, %v47_v20 }
 0x185   :  { %v53_v22 = vmul.f32 %v52_v21, %v35_v9 }
 0x187   :  { %54 = vst.msk [vmem:[#allocation5] sm:$0xff] %vm24_vm0, %v53_v22 }
 0x188   :  { %65 = dma.vmem_to_hbm [thread:$0]  %s61_s11, 128, %s63_s14, [#allocation4]  }
 0x189   :  { %128 = dma.done.wait [#allocation4], 128  }
 0x18a   :  { %129 = vsyncadd [#allocation4], 4294967168 }
 0x18b   :  { %70 = vsyncpa [#allocation3], 1 }
 0x18c   :  { %71 = vsyncpa [#allocation4], 1 }

</bundles_post_ra>
